<compile_context>
chip_gen: v5e
topology: v5e:2x2
jax: 0.10.0
libtpu: 0.0.40
codegen_flags: <defaults>
</compile_context>

<pallas_src>
import functools

import jax
import jax.numpy as jnp
from jax import lax
from jax.experimental import pallas as pl
from jax.experimental.pallas import tpu as pltpu

LANE = 128
SUBLANE = 8
_MASK_VALUE = -1e30  # effectively -inf for padded action lanes


def _round_up(n, m):
    return ((n + m - 1) // m) * m


def _policy_mlp_kernel(x_ref, w1_ref, b1_ref, w2_ref, b2_ref, w3_ref, b3_ref,
                       probs_ref, logp_ref, *, action_dim):
    """One batch tile: x [TB, S_pad] bf16 -> probs/logp [TB, A_pad] f32."""
    x = x_ref[...]

    # Layer 1: Linear + ReLU (MXU matmul in bf16, f32 accumulate; VPU in f32)
    h1 = jnp.dot(x, w1_ref[...], preferred_element_type=jnp.float32) + b1_ref[...]
    h1 = jnp.maximum(h1, 0.0)

    # Layer 2: Linear + ReLU
    h2 = jnp.dot(h1.astype(w2_ref.dtype), w2_ref[...],
                 preferred_element_type=jnp.float32) + b2_ref[...]
    h2 = jnp.maximum(h2, 0.0)

    # Layer 3: Linear -> logits (padded lanes masked before softmax)
    logits = jnp.dot(h2.astype(w3_ref.dtype), w3_ref[...],
                     preferred_element_type=jnp.float32) + b3_ref[...]
    lane_idx = lax.broadcasted_iota(jnp.int32, logits.shape, 1)
    logits = jnp.where(lane_idx < action_dim, logits, _MASK_VALUE)

    # Numerically stable softmax + log-softmax over the action lanes.
    m = jnp.max(logits, axis=-1, keepdims=True)
    shifted = logits - m
    e = jnp.exp(shifted)
    denom = jnp.sum(e, axis=-1, keepdims=True)

    probs_ref[...] = (e / denom).astype(probs_ref.dtype)          # exact: rows sum to 1
    logp_ref[...] = (shifted - jnp.log(denom)).astype(logp_ref.dtype)


def prepare_params(w1, b1, w2, b2, w3, b3, compute_dtype=jnp.bfloat16):
    """Zero-pad feature dims to lane width; cast matmul inputs to bf16 once."""
    def pad2(a, rows, cols):
        return jnp.pad(a, ((0, rows - a.shape[0]), (0, cols - a.shape[1])))

    s, h = w1.shape
    a = w3.shape[1]
    s_pad, h_pad, a_pad = _round_up(s, LANE), _round_up(h, LANE), _round_up(a, LANE)

    w1p = pad2(w1, s_pad, h_pad).astype(compute_dtype)
    w2p = pad2(w2, h_pad, h_pad).astype(compute_dtype)
    w3p = pad2(w3, h_pad, a_pad).astype(compute_dtype)
    b1p = pad2(b1, 1, h_pad).astype(jnp.float32)
    b2p = pad2(b2, 1, h_pad).astype(jnp.float32)
    b3p = pad2(b3, 1, a_pad).astype(jnp.float32)
    return w1p, b1p, w2p, b2p, w3p, b3p


@functools.partial(jax.jit, static_argnames=("action_dim", "block_b"))
def abra_agent_forward(x, w1p, b1p, w2p, b2p, w3p, b3p, *, action_dim,
                       block_b=512):
    """Returns (probs [B, action_dim], log_probs [B, action_dim]) in f32."""
    B, S = x.shape
    s_pad = w1p.shape[0]
    h_pad = w2p.shape[0]
    a_pad = w3p.shape[1]
    compute_dtype = w1p.dtype

    # Batch tile: multiple of 8 sublanes, capped by block_b; pad B to fit grid.
    tb = _round_up(min(block_b, B), SUBLANE)
    b_pad = _round_up(B, tb)
    xp = jnp.pad(x.astype(compute_dtype), ((0, b_pad - B), (0, s_pad - S)))

    kernel = functools.partial(_policy_mlp_kernel, action_dim=action_dim)

    probs_pad, logp_pad = pl.pallas_call(
        kernel,
        out_shape=(
            jax.ShapeDtypeStruct((b_pad, a_pad), jnp.float32),
            jax.ShapeDtypeStruct((b_pad, a_pad), jnp.float32),
        ),
        grid_spec=pltpu.PrefetchScalarGridSpec(
            num_scalar_prefetch=0,
            grid=(b_pad // tb,),
            in_specs=[
                pl.BlockSpec((tb, s_pad), lambda i: (i, 0)),       # x: streamed
                pl.BlockSpec((s_pad, h_pad), lambda i: (0, 0)),    # weights: resident
                pl.BlockSpec((1, h_pad), lambda i: (0, 0)),
                pl.BlockSpec((h_pad, h_pad), lambda i: (0, 0)),
                pl.BlockSpec((1, h_pad), lambda i: (0, 0)),
                pl.BlockSpec((h_pad, a_pad), lambda i: (0, 0)),
                pl.BlockSpec((1, a_pad), lambda i: (0, 0)),
            ],
            out_specs=[
                pl.BlockSpec((tb, a_pad), lambda i: (i, 0)),
                pl.BlockSpec((tb, a_pad), lambda i: (i, 0)),
            ],
        ),
        compiler_params=pltpu.CompilerParams(
            dimension_semantics=("parallel",)),
    )(xp, w1p, b1p, w2p, b2p, w3p, b3p)

    return probs_pad[:B, :action_dim], logp_pad[:B, :action_dim]


def init_params(key, state_dim, action_dim, hidden_dim):
    """nn.Linear-style init (U[-1/sqrt(fan_in), +]); weights stored [in, out]."""
    ks = jax.random.split(key, 6)

    def lin(kw, kb, fan_in, fan_out):
        bound = 1.0 / jnp.sqrt(jnp.float32(fan_in))
        w = jax.random.uniform(kw, (fan_in, fan_out), jnp.float32, -bound, bound)
        b = jax.random.uniform(kb, (1, fan_out), jnp.float32, -bound, bound)
        return w, b

    w1, b1 = lin(ks[0], ks[1], state_dim, hidden_dim)
    w2, b2 = lin(ks[2], ks[3], hidden_dim, hidden_dim)
    w3, b3 = lin(ks[4], ks[5], hidden_dim, action_dim)
    return w1, b1, w2, b2, w3, b3


def select_action(probs, logp, deterministic=True, key=None):
    """Equivalent of ABRAAgent.select_action on kernel outputs."""
    if deterministic:
        action = jnp.argmax(probs, axis=-1)
    else:
        action = jax.random.categorical(key, logp, axis=-1)
    log_prob = jnp.take_along_axis(logp, action[:, None], axis=-1)[:, 0]
    return action, log_prob


def _reference(x, w1, b1, w2, b2, w3, b3, compute_dtype=jnp.bfloat16):
    """Pure-JAX reference mirroring the kernel's bf16-matmul / f32-accum math."""
    cd = compute_dtype
    h1 = jnp.maximum(
        jnp.dot(x.astype(cd), w1.astype(cd), preferred_element_type=jnp.float32) + b1, 0.0)
    h2 = jnp.maximum(
        jnp.dot(h1.astype(cd), w2.astype(cd), preferred_element_type=jnp.float32) + b2, 0.0)
    logits = jnp.dot(h2.astype(cd), w3.astype(cd),
                     preferred_element_type=jnp.float32) + b3
    return jax.nn.softmax(logits, axis=-1), jax.nn.log_softmax(logits, axis=-1)


if __name__ == "__main__":
    # Small shapes consistent with the module (action_dim=2 per docstring).
    B, state_dim, action_dim, hidden_dim = 8, 16, 2, 32

    key = jax.random.PRNGKey(0)
    k_x, k_p = jax.random.split(key)
    x = jax.random.normal(k_x, (B, state_dim), jnp.float32)
    raw_params = init_params(k_p, state_dim, action_dim, hidden_dim)

    # Pad/cast once (done outside the hot rollout loop).
    prepared = prepare_params(*raw_params)

    probs, logp = abra_agent_forward(x, *prepared, action_dim=action_dim)
    probs, logp = jax.block_until_ready((probs, logp))

    ref_probs, ref_logp = _reference(x, *raw_params)

    assert probs.shape == (B, action_dim)
    assert logp.shape == (B, action_dim)
    assert jnp.allclose(jnp.sum(probs, axis=-1), 1.0, atol=1e-5)
    assert jnp.allclose(probs, ref_probs, atol=1e-3, rtol=1e-3)
    assert jnp.allclose(logp, ref_logp, atol=1e-3, rtol=1e-3)

    action, log_prob = select_action(probs, logp, deterministic=True)
    jax.block_until_ready((action, log_prob))
    assert jnp.allclose(log_prob,
                        jnp.take_along_axis(ref_logp, action[:, None], axis=-1)[:, 0],
                        atol=1e-3)

    print("KERNEL_OK")
</pallas_src>

<mosaic_0001>
module attributes {stable_mosaic.version = 11 : i64} {
  func.func @_policy_mlp_kernel(%arg0: i32, %arg1: memref<8x128xbf16, #tpu.memory_space<vmem>>, %arg2: memref<128x128xbf16, #tpu.memory_space<vmem>>, %arg3: memref<1x128xf32, #tpu.memory_space<vmem>>, %arg4: memref<128x128xbf16, #tpu.memory_space<vmem>>, %arg5: memref<1x128xf32, #tpu.memory_space<vmem>>, %arg6: memref<128x128xbf16, #tpu.memory_space<vmem>>, %arg7: memref<1x128xf32, #tpu.memory_space<vmem>>, %arg8: memref<8x128xf32, #tpu.memory_space<vmem>>, %arg9: memref<8x128xf32, #tpu.memory_space<vmem>>) attributes {dimension_semantics = [#tpu.dimension_semantics<parallel>], iteration_bounds = array<i64: 1>, scalar_prefetch = 0 : i64, scratch_operands = 0 : i64, tpu.core_type = #tpu.core_type<tc>, window_params = [{transform_indices = @transform_0, window_bounds = array<i64: 8, 128>}, {pipeline_mode = #tpu.pipeline_mode<synchronous>, transform_indices = @transform_1, window_bounds = array<i64: 128, 128>}, {pipeline_mode = #tpu.pipeline_mode<synchronous>, transform_indices = @transform_2, window_bounds = array<i64: 1, 128>}, {pipeline_mode = #tpu.pipeline_mode<synchronous>, transform_indices = @transform_3, window_bounds = array<i64: 128, 128>}, {pipeline_mode = #tpu.pipeline_mode<synchronous>, transform_indices = @transform_4, window_bounds = array<i64: 1, 128>}, {pipeline_mode = #tpu.pipeline_mode<synchronous>, transform_indices = @transform_5, window_bounds = array<i64: 128, 128>}, {pipeline_mode = #tpu.pipeline_mode<synchronous>, transform_indices = @transform_6, window_bounds = array<i64: 1, 128>}, {transform_indices = @transform_7, window_bounds = array<i64: 8, 128>}, {transform_indices = @transform_8, window_bounds = array<i64: 8, 128>}]} {
    %c0 = arith.constant 0 : index
    %c0_0 = arith.constant 0 : index
    %0 = vector.load %arg1[%c0, %c0_0] : memref<8x128xbf16, #tpu.memory_space<vmem>>, vector<8x128xbf16>
    %c0_1 = arith.constant 0 : index
    %c0_2 = arith.constant 0 : index
    %1 = vector.load %arg2[%c0_1, %c0_2] : memref<128x128xbf16, #tpu.memory_space<vmem>>, vector<128x128xbf16>
    %cst = arith.constant dense<0.000000e+00> : vector<8x128xf32>
    %2 = tpu.matmul %0, %1, %cst {dimension_numbers = #tpu.dot_dimension_numbers<[1], [0], [0], [1], [0, 0, 1, 1], [], []>} : vector<8x128xbf16>, vector<128x128xbf16>, vector<8x128xf32> -> vector<8x128xf32>
    %c0_3 = arith.constant 0 : index
    %c0_4 = arith.constant 0 : index
    %3 = vector.load %arg3[%c0_3, %c0_4] : memref<1x128xf32, #tpu.memory_space<vmem>>, vector<1x128xf32>
    %4 = vector.broadcast %3 : vector<1x128xf32> to vector<8x128xf32>
    %5 = arith.addf %2, %4 : vector<8x128xf32>
    %cst_5 = arith.constant 0.000000e+00 : f32
    %6 = vector.broadcast %cst_5 : f32 to vector<8x128xf32>
    %7 = arith.maximumf %5, %6 : vector<8x128xf32>
    %8 = arith.truncf %7 : vector<8x128xf32> to vector<8x128xbf16>
    %c0_6 = arith.constant 0 : index
    %c0_7 = arith.constant 0 : index
    %9 = vector.load %arg4[%c0_6, %c0_7] : memref<128x128xbf16, #tpu.memory_space<vmem>>, vector<128x128xbf16>
    %cst_8 = arith.constant dense<0.000000e+00> : vector<8x128xf32>
    %10 = tpu.matmul %8, %9, %cst_8 {dimension_numbers = #tpu.dot_dimension_numbers<[1], [0], [0], [1], [0, 0, 1, 1], [], []>} : vector<8x128xbf16>, vector<128x128xbf16>, vector<8x128xf32> -> vector<8x128xf32>
    %c0_9 = arith.constant 0 : index
    %c0_10 = arith.constant 0 : index
    %11 = vector.load %arg5[%c0_9, %c0_10] : memref<1x128xf32, #tpu.memory_space<vmem>>, vector<1x128xf32>
    %12 = vector.broadcast %11 : vector<1x128xf32> to vector<8x128xf32>
    %13 = arith.addf %10, %12 : vector<8x128xf32>
    %cst_11 = arith.constant 0.000000e+00 : f32
    %14 = vector.broadcast %cst_11 : f32 to vector<8x128xf32>
    %15 = arith.maximumf %13, %14 : vector<8x128xf32>
    %16 = arith.truncf %15 : vector<8x128xf32> to vector<8x128xbf16>
    %c0_12 = arith.constant 0 : index
    %c0_13 = arith.constant 0 : index
    %17 = vector.load %arg6[%c0_12, %c0_13] : memref<128x128xbf16, #tpu.memory_space<vmem>>, vector<128x128xbf16>
    %cst_14 = arith.constant dense<0.000000e+00> : vector<8x128xf32>
    %18 = tpu.matmul %16, %17, %cst_14 {dimension_numbers = #tpu.dot_dimension_numbers<[1], [0], [0], [1], [0, 0, 1, 1], [], []>} : vector<8x128xbf16>, vector<128x128xbf16>, vector<8x128xf32> -> vector<8x128xf32>
    %c0_15 = arith.constant 0 : index
    %c0_16 = arith.constant 0 : index
    %19 = vector.load %arg7[%c0_15, %c0_16] : memref<1x128xf32, #tpu.memory_space<vmem>>, vector<1x128xf32>
    %20 = vector.broadcast %19 : vector<1x128xf32> to vector<8x128xf32>
    %21 = arith.addf %18, %20 : vector<8x128xf32>
    %22 = tpu.iota {dimensions = array<i32: 1>} : vector<8x128xi32>
    %c2_i32 = arith.constant 2 : i32
    %23 = vector.broadcast %c2_i32 : i32 to vector<8x128xi32>
    %24 = arith.cmpi slt, %22, %23 : vector<8x128xi32>
    %cst_17 = arith.constant -1.000000e+30 : f32
    %25 = vector.broadcast %cst_17 : f32 to vector<8x128xf32>
    %26 = arith.select %24, %21, %25 : vector<8x128xi1>, vector<8x128xf32>
    %cst_18 = arith.constant dense<0xFF800000> : vector<8xf32>
    %27 = vector.multi_reduction <maximumf>, %26, %cst_18 [1] : vector<8x128xf32> to vector<8xf32>
    %28 = vector.shape_cast %27 : vector<8xf32> to vector<8x1xf32>
    %29 = vector.broadcast %28 : vector<8x1xf32> to vector<8x128xf32>
    %30 = arith.subf %26, %29 : vector<8x128xf32>
    %31 = math.exp %30 : vector<8x128xf32>
    %cst_19 = arith.constant dense<0.000000e+00> : vector<8xf32>
    %32 = vector.multi_reduction <add>, %31, %cst_19 [1] : vector<8x128xf32> to vector<8xf32>
    %33 = vector.shape_cast %32 : vector<8xf32> to vector<8x1xf32>
    %34 = vector.broadcast %33 : vector<8x1xf32> to vector<8x128xf32>
    %35 = arith.divf %31, %34 : vector<8x128xf32>
    %c0_20 = arith.constant 0 : index
    %c0_21 = arith.constant 0 : index
    %36 = vector.load %arg8[%c0_20, %c0_21] : memref<8x128xf32, #tpu.memory_space<vmem>>, vector<8x128xf32>
    tpu.vector_store %arg8[%c0_20, %c0_21], %35 {strides = array<i32>} : memref<8x128xf32, #tpu.memory_space<vmem>>, vector<8x128xf32>,
    %37 = math.log %33 : vector<8x1xf32>
    %38 = vector.broadcast %37 : vector<8x1xf32> to vector<8x128xf32>
    %39 = arith.subf %30, %38 : vector<8x128xf32>
    %c0_22 = arith.constant 0 : index
    %c0_23 = arith.constant 0 : index
    %40 = vector.load %arg9[%c0_22, %c0_23] : memref<8x128xf32, #tpu.memory_space<vmem>>, vector<8x128xf32>
    tpu.vector_store %arg9[%c0_22, %c0_23], %39 {strides = array<i32>} : memref<8x128xf32, #tpu.memory_space<vmem>>, vector<8x128xf32>,
    return
  }
  func.func @transform_0(%arg0: i32) -> (i32, i32) {
    %c0_i32 = arith.constant 0 : i32
    %c0_i32_0 = arith.constant 0 : i32
    return %arg0, %c0_i32 : i32, i32
  }
  func.func @transform_1(%arg0: i32) -> (i32, i32) {
    %c0_i32 = arith.constant 0 : i32
    %c0_i32_0 = arith.constant 0 : i32
    %c0_i32_1 = arith.constant 0 : i32
    return %c0_i32, %c0_i32_0 : i32, i32
  }
  func.func @transform_2(%arg0: i32) -> (i32, i32) {
    %c0_i32 = arith.constant 0 : i32
    %c0_i32_0 = arith.constant 0 : i32
    %c0_i32_1 = arith.constant 0 : i32
    return %c0_i32, %c0_i32_0 : i32, i32
  }
  func.func @transform_3(%arg0: i32) -> (i32, i32) {
    %c0_i32 = arith.constant 0 : i32
    %c0_i32_0 = arith.constant 0 : i32
    %c0_i32_1 = arith.constant 0 : i32
    return %c0_i32, %c0_i32_0 : i32, i32
  }
  func.func @transform_4(%arg0: i32) -> (i32, i32) {
    %c0_i32 = arith.constant 0 : i32
    %c0_i32_0 = arith.constant 0 : i32
    %c0_i32_1 = arith.constant 0 : i32
    return %c0_i32, %c0_i32_0 : i32, i32
  }
  func.func @transform_5(%arg0: i32) -> (i32, i32) {
    %c0_i32 = arith.constant 0 : i32
    %c0_i32_0 = arith.constant 0 : i32
    %c0_i32_1 = arith.constant 0 : i32
    return %c0_i32, %c0_i32_0 : i32, i32
  }
  func.func @transform_6(%arg0: i32) -> (i32, i32) {
    %c0_i32 = arith.constant 0 : i32
    %c0_i32_0 = arith.constant 0 : i32
    %c0_i32_1 = arith.constant 0 : i32
    return %c0_i32, %c0_i32_0 : i32, i32
  }
  func.func @transform_7(%arg0: i32) -> (i32, i32) {
    %c0_i32 = arith.constant 0 : i32
    %c0_i32_0 = arith.constant 0 : i32
    return %arg0, %c0_i32 : i32, i32
  }
  func.func @transform_8(%arg0: i32) -> (i32, i32) {
    %c0_i32 = arith.constant 0 : i32
    %c0_i32_0 = arith.constant 0 : i32
    return %arg0, %c0_i32 : i32, i32
  }
}

</mosaic_0001>

<bundles_post_ra>
// kernel: abra_agent_forward.1
= control target key start
LH: loop header
LB: loop body
LE: loop exit
PB: predicated region body
PF: predicated region fallthrough
CT: control target
= control target key end

     0   :  { %14 = vsyncpa [#allocation3], 0  ;;  %s651_s0 = inlined_call_operand.vmem [shape: bf16[8,128], index: 0, kind: input, shape index: {}]   ;;  %s652_s1 = inlined_call_operand.hbm [shape: bf16[128,128], index: 1, kind: input, shape index: {}]   ;;  %s653_s2 = inlined_call_operand.vmem [shape: f32[1,128], index: 2, kind: input, shape index: {}]   ;;  %s654_s3 = inlined_call_operand.hbm [shape: bf16[128,128], index: 3, kind: input, shape index: {}]   ;;  %s655_s4 = inlined_call_operand.vmem [shape: f32[1,128], index: 4, kind: input, shape index: {}]   ;;  %s656_s5 = inlined_call_operand.hbm [shape: bf16[128,128], index: 5, kind: input, shape index: {}]   ;;  %s657_s6 = inlined_call_operand.vmem [shape: f32[1,128], index: 6, kind: input, shape index: {}]   ;;  %s658_s7 = inlined_call_operand.vmem [shape: f32[8,128], index: 7, kind: output, shape index: {0}]   ;;  %s659_s8 = inlined_call_operand.vmem [shape: f32[8,128], index: 8, kind: output, shape index: {1}]  }
   0x1   :  { %15 = vsyncpa [#allocation5], 0  ;;  %s37_s29 = sshll.u32 %s654_s3, 4  ;;  %s574_s30 = smov [#allocation4]   ;;  %s38_s29 = int_to_ptr.hbm [resolvable:$true] %s37_s29 }
   0x2   :  { %s39_s9 = sshll.u32 %s574_s30, 4  ;;  %s22_s12 = sshll.u32 %s652_s1, 4  ;;  %s40_s9 = int_to_ptr.vmem [resolvable:$true] %s39_s9  ;;  %s23_s12 = int_to_ptr.hbm [resolvable:$true] %s22_s12 }
   0x3   :  { %s575_s13 = smov 64   ;;  %s576_s14 = smov 4  }
   0x4   :  { %45 = dma.hbm_to_vmem [thread:$0]  %s38_s29, 1024, %s40_s9, [#allocation5], %s575_s13, %s575_s13, %s576_s14  }
   0x5   :  { %s577_s15 = smov [#allocation2]   ;;  %s52_s19 = sshll.u32 %s656_s5, 4  ;;  %s53_s19 = int_to_ptr.hbm [resolvable:$true] %s52_s19 }
   0x6   :  { %s24_s16 = sshll.u32 %s577_s15, 4  ;;  %s578_s3 = smov [#allocation6]   ;;  %s25_s16 = int_to_ptr.vmem [resolvable:$true] %s24_s16 }
   0x7   :  { %30 = dma.hbm_to_vmem [thread:$0]  %s23_s12, 1024, %s25_s16, [#allocation3], %s575_s13, %s575_s13, %s576_s14  }
   0x8   :  { %s54_s20 = sshll.u32 %s578_s3, 4  ;;  %s55_s20 = int_to_ptr.vmem [resolvable:$true] %s54_s20 }
   0x9   :  { %60 = dma.hbm_to_vmem [thread:$0]  %s53_s19, 1024, %s55_s20, [#allocation5], %s575_s13, %s575_s13, %s576_s14  }
   0xa   :  { %570 = dma.done.wait [#allocation3], 1024  }
   0xb   :  { %571 = vsyncadd [#allocation3], 4294966272 }
   0xc   :  { %572 = dma.done.wait [#allocation5], 2048  }
   0xd   :  { %573 = vsyncadd [#allocation5], 4294965248  ;;  %v467_v0 = vld [vmem:[#allocation2 + $0x38] sm:$0xff]  ;;  %v466_v1 = vld [vmem:[#allocation2 + $0x30] sm:$0xff]  ;;  %v323_v37 = vlaneseq }
   0xe   :  { %144 = vmatpush.bf16.msra.mxu0 %v467_v0  ;;  %v475_v2 = vld [vmem:[#allocation4 + $0x38] sm:$0xff]  ;;  %v474_v3 = vld [vmem:[#allocation4 + $0x30] sm:$0xff]  ;;  %v465_v4 = vld [vmem:[#allocation2 + $0x28] sm:$0xff] }
   0xf   :  { %227 = vmatpush.bf16.msra.mxu1 %v475_v2  ;;  %v473_v5 = vld [vmem:[#allocation4 + $0x28] sm:$0xff]  ;;  %v464_v6 = vld [vmem:[#allocation2 + $0x20] sm:$0xff]  ;;  %v463_v8 = vld [vmem:[#allocation2 + $0x18] sm:$0xff]  ;;  %v324_v38 = vand.u32 127, %v323_v37 }
  0x10   :  { %v472_v7 = vld [vmem:[#allocation4 + $0x20] sm:$0xff]  ;;  %v471_v9 = vld [vmem:[#allocation4 + $0x18] sm:$0xff]  ;;  %v462_v10 = vld [vmem:[#allocation2 + $0x10] sm:$0xff] }
  0x11   :  { %v470_v11 = vld [vmem:[#allocation4 + $0x10] sm:$0xff]  ;;  %v461_v12 = vld [vmem:[#allocation2 + $0x8] sm:$0xff]  ;;  %v460_v13 = vld [vmem:[#allocation2] sm:$0xff]  ;;  %vm325_vm0 = vcmp.lt.s32.totalorder %v324_v38, 2 }
  0x12   :  { %145 = vmatpush.bf16.msra.mxu0 %v466_v1  ;;  %v75_v14 = vld [vmem:[%s651_s0] sm:$0xf]  ;;  %v469_v15 = vld [vmem:[#allocation4 + $0x8] sm:$0xff]  ;;  %v483_v17 = vld [vmem:[#allocation6 + $0x38] sm:$0xff] }
  0x13   :  { %228 = vmatpush.bf16.msra.mxu1 %v474_v3  ;;  %v468_v16 = vld [vmem:[#allocation4] sm:$0xff]  ;;  %310 = vmatpush.bf16.msra.mxu2 %v483_v17  ;;  %v482_v18 = vld [vmem:[#allocation6 + $0x30] sm:$0xff]  ;;  %v481_v19 = vld [vmem:[#allocation6 + $0x28] sm:$0xff] }
  0x14   :  { %v480_v20 = vld [vmem:[#allocation6 + $0x20] sm:$0xff]  ;;  %v479_v21 = vld [vmem:[#allocation6 + $0x18] sm:$0xff]  ;;  %v478_v22 = vld [vmem:[#allocation6 + $0x10] sm:$0xff] }
  0x15   :  { %v489_v23 = vld [vmem:[%s653_s2] ss:$0 sm:$0xff]  ;;  %v477_v29 = vld [vmem:[#allocation6 + $0x8] sm:$0xff] }
  0x16   :  { %146 = vmatpush.bf16.msra.mxu0 %v465_v4  ;;  %v476_v30 = vld [vmem:[#allocation6] sm:$0xff] }
  0x17   :  { %229 = vmatpush.bf16.msra.mxu1 %v473_v5  ;;  %311 = vmatpush.bf16.msra.mxu2 %v482_v18  ;;  %v490_v31 = vld [vmem:[%s655_s4] ss:$0 sm:$0xff] }
  0x18   :  { %v491_v39 = vld [vmem:[%s657_s6] ss:$0 sm:$0xff] }
  0x1a   :  { %147 = vmatpush.bf16.msra.mxu0 %v464_v6 }
  0x1b   :  { %230 = vmatpush.bf16.msra.mxu1 %v472_v7  ;;  %312 = vmatpush.bf16.msra.mxu2 %v481_v19 }
  0x1e   :  { %148 = vmatpush.bf16.msra.mxu0 %v463_v8 }
  0x1f   :  { %231 = vmatpush.bf16.msra.mxu1 %v471_v9  ;;  %313 = vmatpush.bf16.msra.mxu2 %v480_v20 }
  0x22   :  { %149 = vmatpush.bf16.msra.mxu0 %v462_v10 }
  0x23   :  { %232 = vmatpush.bf16.msra.mxu1 %v470_v11  ;;  %314 = vmatpush.bf16.msra.mxu2 %v479_v21 }
  0x26   :  { %150 = vmatpush.bf16.msra.mxu0 %v461_v12 }
  0x27   :  { %233 = vmatpush.bf16.msra.mxu1 %v469_v15  ;;  %315 = vmatpush.bf16.msra.mxu2 %v478_v22 }
  0x2a   :  { %151 = vmatpush.bf16.msra.mxu0 %v460_v13 }
  0x2b   :  { %234 = vmatpush.bf16.msra.mxu1 %v468_v16  ;;  %316 = vmatpush.bf16.msra.mxu2 %v477_v29 }
  0x2d   :  { %152 = vmatmul.bf16.vlgmr.msra.gmra.mxu0 %v75_v14 }
  0x2f   :  { %317 = vmatpush.bf16.msra.mxu2 %v476_v30 }
  0xaa   :  { %v153_v24 = vpop.f32.mrf.mxu0 }
  0xab   :  { %v154_v25 = vadd.f32 %v489_v23, %v153_v24 }
  0xad   :  { %v157_v26 = vmax.f32 %v154_v25, 0.0 }
  0xaf   :  { %v158_v27 = vpack.c.bf16 %v157_v26, %v157_v26 }
  0xb1   :  { %235 = vmatmul.bf16.vlgmr.msra.gmra.mxu1 %v158_v27 }
  0xb2   :  { %v155_v28 = vpop.f32.mrf.mxu0 }
 0x12e   :  { %v236_v32 = vpop.f32.mrf.mxu1 }
 0x12f   :  { %v237_v33 = vadd.f32 %v490_v31, %v236_v32 }
 0x131   :  { %v240_v34 = vmax.f32 %v237_v33, 0.0 }
 0x133   :  { %v241_v35 = vpack.c.bf16 %v240_v34, %v240_v34 }
 0x135   :  { %318 = vmatmul.bf16.vlgmr.msra.gmra.mxu2 %v241_v35 }
 0x136   :  { %v238_v36 = vpop.f32.mrf.mxu1 }
 0x1b8   :  { %v319_v40 = vpop.f32.mrf.mxu2 }
 0x1b9   :  { %v320_v41 = vadd.f32 %v491_v39, %v319_v40 }
 0x1bb   :  { %v326_v42 = vsel %vm325_vm0, %v320_v41, -1e+30 }
 0x1bc   :  { %327 = vmax.xlane.f32.xlu0 %v326_v42 }
 0x1c0   :  { %v321_v43 = vpop.f32.mrf.mxu2 }
 0x22f   :  { %v328_v44 = vpop.xlane.xlu0 %327 }
 0x230   :  { %v329_v45 = vsub.f32 %v326_v42, %v328_v44 }
 0x232   :  { %v330_v46 = vmul.f32 1.442695, %v329_v45 }
 0x234   :  { %492 = vpow2.f32 %v330_v46 }
 0x23a   :  { %v493_v47 = vpop.eup %492 }
 0x23b   :  { %332 = vadd.xlane.f32.xlu0 %v493_v47 }
 0x2ae   :  { %v333_v48 = vpop.xlane.xlu0 %332 }
 0x2af   :  { %494 = vrcp.f32 %v333_v48  ;;  %v345_v54 = vand.u32 2147483648, %v333_v48  ;;  %v343_v57 = vand.u32 2147483647, %v333_v48  ;;  %vm339_vm2 = vweird.f32 %v333_v48 }
 0x2b0   :  { %496 = vlog2.f32 %v333_v48 }
 0x2b1   :  { %v346_v59 = vor.u32 1.1754944e-38, %v345_v54  ;;  %vm344_vm4 = vcmp.eq.f32.partialorder %v343_v57, 8.507059e+37 }
 0x2b5   :  { %v495_v49 = vpop.eup %494 }
 0x2b6   :  { %v497_v50 = vpop.eup %496  ;;  %v335_v51 = vmul.f32 %v495_v49, %v333_v48  ;;  %vm340_vm1 = vweird.f32 %v495_v49 }
 0x2b7   :  { %v351_v52 = vmul.f32 0.6931472, %v497_v50  ;;  %vm341_vm3 = vmor %vm339_vm2, %vm340_vm1 }
 0x2b8   :  { %v336_v53 = vsub.f32 1.0, %v335_v51 }
 0x2b9   :  { %v352_v55 = vsub.f32 %v329_v45, %v351_v52 }
 0x2ba   :  { %v337_v56 = vmul.f32 %v495_v49, %v336_v53 }
 0x2bb   :  { %353 = vst [vmem:[%s659_s8] sm:$0xff] %v352_v55 }
 0x2bc   :  { %v338_v58 = vadd.f32 %v495_v49, %v337_v56 }
 0x2be   :  { %v342_v60 = vsel %vm341_vm3, %v495_v49, %v338_v58 }
 0x2bf   :  { %v347_v61 = vsel %vm344_vm4, %v346_v59, %v342_v60 }
 0x2c0   :  { %v348_v62 = vmul.f32 %v493_v47, %v347_v61 }
 0x2c2   :  { %349 = vst [vmem:[%s658_s7] sm:$0xff] %v348_v62 }
 0x2c3   :  { %362 = vsyncpa [#allocation3], 1 }
 0x2c4   :  { %363 = vsyncpa [#allocation5], 1 }

</bundles_post_ra>
